<compile_context>
chip_gen: v6e
topology: v6e:2x2x1
jax: 0.10.0
libtpu: 0.0.40
codegen_flags: <defaults>
</compile_context>

<pallas_src>
import functools
import math

import jax
import jax.numpy as jnp
from jax.experimental import pallas as pl
from jax.experimental.pallas import tpu as pltpu


def _round_up(a: int, b: int) -> int:
    return (a + b - 1) // b * b


# --------------------------------------------------------------------------
# Kernels
# --------------------------------------------------------------------------
def _proj_kernel_single_k(x_ref, w_ref, o_ref, *, compute_dtype):
    """Grid = (M tiles, N tiles); whole K contraction in one block."""
    x = x_ref[...]
    w = w_ref[...]
    if compute_dtype is not None:
        # Cast immediately adjacent to the dot (VPU op hidden under the MXU).
        x = x.astype(compute_dtype)
        w = w.astype(compute_dtype)
    o_ref[...] = jnp.dot(x, w, preferred_element_type=jnp.float32).astype(o_ref.dtype)


def _proj_kernel_multi_k(x_ref, w_ref, o_ref, acc_ref, *, compute_dtype):
    """Grid = (M tiles, N tiles, K tiles); K is the trailing reduction axis."""
    k = pl.program_id(2)

    @pl.when(k == 0)
    def _():
        acc_ref[...] = jnp.zeros_like(acc_ref)

    x = x_ref[...]
    w = w_ref[...]
    if compute_dtype is not None:
        x = x.astype(compute_dtype)
        w = w.astype(compute_dtype)
    acc_ref[...] += jnp.dot(x, w, preferred_element_type=jnp.float32)

    @pl.when(k == pl.num_programs(2) - 1)
    def _():
        o_ref[...] = acc_ref[...].astype(o_ref.dtype)


# --------------------------------------------------------------------------
# Tiling / VMEM policy
# --------------------------------------------------------------------------
def _vmem_caps():
    """Per-generation (tile_budget_bytes, vmem_limit_bytes)."""
    try:
        cap = pltpu.get_tpu_info().vmem_capacity_bytes
    except Exception:
        cap = 64 << 20  # conservative (v7x-sized) fallback
    tile_budget = min((cap * 2) // 3, 80 << 20)   # v7x ~42 MiB, v5e/v6e 80 MiB
    vmem_limit = max(32 << 20, min((cap * 3) // 4, 100 << 20))
    return int(tile_budget), int(vmem_limit)


def _pick_tile_k(k: int) -> int:
    """Waste-aware K tile: full-extent when small, else ~1 KiB-ish chunks."""
    if k <= 1024:
        return k
    nk = -(-k // 1024)
    return _round_up(-(-k // nk), 128)


def _tile_k_for_padded(k_pad: int) -> int:
    """Tile K for an already-padded K extent (must divide k_pad)."""
    if k_pad <= 1024:
        return k_pad
    for cand in range(1024, 127, -128):
        if k_pad % cand == 0:
            return cand
    return k_pad  # non-128-multiple padded K: fall back to a single block


def _pick_tiles(m, k_pad, n_pad, x_isz, w_isz, o_isz, sublane, budget):
    tile_k = _tile_k_for_padded(k_pad)
    k_blocks = k_pad // tile_k
    needs_acc = k_blocks > 1

    def vmem(tm, tn):
        b = 2 * tm * tile_k * x_isz          # x, double-buffered
        b += 2 * tile_k * tn * w_isz         # w, double-buffered
        b += 2 * tm * tn * o_isz             # out, double-buffered (out dtype!)
        if needs_acc:
            b += tm * tn * 4                 # resident f32 accumulator
        return b

    # N tile: lane-dense multiple of 128 that divides the pre-padded n_pad.
    tile_n = min(n_pad, 1024)
    while tile_n > 128 and (n_pad % tile_n != 0 or vmem(sublane, tile_n) > budget):
        tile_n -= 128

    # M tile: biggest sublane multiple that fits; prefer a divisor of m so the
    # x pad and output slice become no-ops (only if it costs <= 2x tile size).
    m_ceil = _round_up(max(m, 1), sublane)
    tile_m = min(1024, m_ceil)
    while tile_m > sublane and vmem(tile_m, tile_n) > budget:
        tile_m -= sublane
    if m > 0 and m % sublane == 0:
        cand = tile_m
        while cand > sublane and m % cand != 0:
            cand -= sublane
        if m % cand == 0 and cand * 2 >= tile_m:
            tile_m = cand

    # Guarantee >=2 blocks along a parallel axis (feed both v7x TensorCores).
    m_blocks = _round_up(max(m, 1), tile_m) // tile_m
    n_blocks = n_pad // tile_n
    if m_blocks == 1 and n_blocks == 1:
        if n_pad % 256 == 0:
            tile_n //= 2
        elif tile_m >= 2 * sublane:
            half = tile_m // 2
            tm = _round_up(half, sublane)
            if m % sublane == 0:
                cand = (half // sublane) * sublane
                while cand > sublane and m % cand != 0:
                    cand -= sublane
                if cand >= sublane and m % cand == 0 and cand * 2 >= half:
                    tm = cand
            tile_m = tm

    return tile_m, tile_k, tile_n


# --------------------------------------------------------------------------
# Weight init / packing (done ONCE, outside the hot path)
# --------------------------------------------------------------------------
def init_projection_weight(key, input_size, units, dtype=jnp.float32):
    """Xavier-uniform init matching nn.init.xavier_uniform_ on a
    (units, input_size) Linear weight; returned transposed as
    (input_size, units) so the kernel computes x @ W^T directly."""
    bound = math.sqrt(6.0 / (input_size + units))
    w = jax.random.uniform(
        key, (units, input_size), dtype=dtype, minval=-bound, maxval=bound
    )
    return w.T  # (input_size, units)


def pack_projection_weight(weight_t, *, compute_dtype=None):
    """Pad (input_size, units) weight once to the kernel tile grid
    (K -> tile_k grid, N -> multiple of 128) and optionally cast it to the
    persistent MXU compute dtype (e.g. bf16). Store the result as the param."""
    k, n = weight_t.shape
    if compute_dtype is not None:
        weight_t = weight_t.astype(compute_dtype)
    k_pad = _round_up(k, _pick_tile_k(k))
    n_pad = _round_up(n, 128)
    if (k_pad, n_pad) != (k, n):
        weight_t = jnp.pad(weight_t, ((0, k_pad - k), (0, n_pad - n)))
    return weight_t


# --------------------------------------------------------------------------
# Forward
# --------------------------------------------------------------------------
@functools.partial(jax.jit, static_argnames=("units", "compute_dtype"))
def projection_forward(x, w_packed, *, units, compute_dtype=None):
    """x: (..., input_size), w_packed: (k_pad, n_pad) -> (..., units)."""
    *lead, k = x.shape
    k_pad, n_pad = w_packed.shape
    assert k <= k_pad and n_pad % 128 == 0 and units <= n_pad
    out_dtype = x.dtype

    m = 1
    for d in lead:
        m *= d
    x2d = x.reshape(m, k)

    # In-kernel cast dtype (no wrapper-side HBM cast pass over x).
    cdt = compute_dtype
    if cdt is None and w_packed.dtype != x.dtype:
        cdt = w_packed.dtype

    x_isz = jnp.dtype(x.dtype).itemsize
    w_isz = jnp.dtype(w_packed.dtype).itemsize
    o_isz = jnp.dtype(out_dtype).itemsize
    sublane = 16 if x_isz == 2 else 8

    tile_budget, vmem_limit = _vmem_caps()
    tile_m, tile_k, tile_n = _pick_tiles(
        m, k_pad, n_pad, x_isz, w_isz, o_isz, sublane, tile_budget
    )

    m_blocks = _round_up(max(m, 1), tile_m) // tile_m
    n_blocks = n_pad // tile_n
    k_blocks = k_pad // tile_k
    m_pad = m_blocks * tile_m

    # Pad x only when unavoidable (tile_m chosen to divide m when possible).
    if (m_pad, k_pad) != (m, k):
        x2d = jnp.pad(x2d, ((0, m_pad - m), (0, k_pad - k)))

    # Deeper weight buffering for GEMV-like shapes (exposed weight DMA on v5e).
    w_spec_kwargs = {}
    if tile_m <= 64 and (n_blocks > 1 or k_blocks > 1):
        w_spec_kwargs["pipeline_mode"] = pl.Buffered(3)

    cost = pl.CostEstimate(
        flops=2 * m_pad * n_pad * k_pad,
        transcendentals=0,
        bytes_accessed=m_pad * k_pad * x_isz * n_blocks   # x re-streamed per N tile
        + k_pad * n_pad * w_isz * m_blocks                # w re-streamed per M tile
        + m_pad * n_pad * o_isz,
    )

    if k_blocks == 1:
        kernel = functools.partial(_proj_kernel_single_k, compute_dtype=cdt)
        grid = (m_blocks, n_blocks)
        in_specs = [
            pl.BlockSpec((tile_m, tile_k), lambda i, j: (i, 0)),
            pl.BlockSpec((tile_k, tile_n), lambda i, j: (0, j), **w_spec_kwargs),
        ]
        out_specs = pl.BlockSpec((tile_m, tile_n), lambda i, j: (i, j))
        scratch_shapes = []
        dims = ("parallel", "parallel")
    else:
        kernel = functools.partial(_proj_kernel_multi_k, compute_dtype=cdt)
        grid = (m_blocks, n_blocks, k_blocks)
        in_specs = [
            pl.BlockSpec((tile_m, tile_k), lambda i, j, kk: (i, kk)),
            pl.BlockSpec((tile_k, tile_n), lambda i, j, kk: (kk, j), **w_spec_kwargs),
        ]
        out_specs = pl.BlockSpec((tile_m, tile_n), lambda i, j, kk: (i, j))
        scratch_shapes = [pltpu.VMEM((tile_m, tile_n), jnp.float32)]
        dims = ("parallel", "parallel", "arbitrary")

    out2d = pl.pallas_call(
        kernel,
        out_shape=jax.ShapeDtypeStruct((m_pad, n_pad), out_dtype),
        grid_spec=pltpu.PrefetchScalarGridSpec(
            num_scalar_prefetch=0,
            grid=grid,
            in_specs=in_specs,
            out_specs=out_specs,
            scratch_shapes=scratch_shapes,
        ),
        compiler_params=pltpu.CompilerParams(
            dimension_semantics=dims,
            vmem_limit_bytes=vmem_limit,
        ),
        cost_estimate=cost,
    )(x2d, w_packed)

    if (m_pad, n_pad) != (m, units):
        out2d = out2d[:m, :units]
    return out2d.reshape(*lead, units)


# --------------------------------------------------------------------------
# Demo / correctness check
# --------------------------------------------------------------------------
if __name__ == "__main__":
    key = jax.random.PRNGKey(0)
    k_x, k_w = jax.random.split(key)

    batch, seq, input_size, units = 2, 8, 32, 64

    x = jax.random.normal(k_x, (batch, seq, input_size), dtype=jnp.float32)
    w_t = init_projection_weight(k_w, input_size, units)          # (K, N) f32
    ref = jnp.einsum("bsk,kn->bsn", x, w_t)

    # f32 path (exact reference check); weight packed/padded once at init.
    w_f32 = pack_projection_weight(w_t)
    out = projection_forward(x, w_f32, units=units)
    out = jax.block_until_ready(out)
    assert out.shape == (batch, seq, units)
    assert jnp.allclose(out, ref, atol=1e-5, rtol=1e-5)

    # bf16 compute path: weight stored persistently in bf16, activations cast
    # inside the kernel next to the dot; f32 accumulation/output.
    w_bf16 = pack_projection_weight(w_t, compute_dtype=jnp.bfloat16)
    out_bf16 = projection_forward(
        x, w_bf16, units=units, compute_dtype=jnp.bfloat16
    )
    out_bf16 = jax.block_until_ready(out_bf16)
    assert out_bf16.shape == (batch, seq, units)
    assert jnp.allclose(out_bf16.astype(jnp.float32), ref, atol=1e-1, rtol=1e-1)

    print("KERNEL_OK")
</pallas_src>

<mosaic_0001>
module attributes {stable_mosaic.version = 11 : i64} {
  func.func @_proj_kernel_single_k(%arg0: i32, %arg1: i32, %arg2: memref<8x32xf32, #tpu.memory_space<vmem>>, %arg3: memref<32x128xf32, #tpu.memory_space<vmem>>, %arg4: memref<8x128xf32, #tpu.memory_space<vmem>>) attributes {dimension_semantics = [#tpu.dimension_semantics<parallel>, #tpu.dimension_semantics<parallel>], iteration_bounds = array<i64: 2, 1>, scalar_prefetch = 0 : i64, scratch_operands = 0 : i64, tpu.core_type = #tpu.core_type<tc>, window_params = [{transform_indices = @transform_0, window_bounds = array<i64: 8, 32>}, {transform_indices = @transform_1, window_bounds = array<i64: 32, 128>}, {transform_indices = @transform_2, window_bounds = array<i64: 8, 128>}]} {
    %c0 = arith.constant 0 : index
    %c0_0 = arith.constant 0 : index
    %0 = vector.load %arg2[%c0, %c0_0] : memref<8x32xf32, #tpu.memory_space<vmem>>, vector<8x32xf32>
    %c0_1 = arith.constant 0 : index
    %c0_2 = arith.constant 0 : index
    %1 = vector.load %arg3[%c0_1, %c0_2] : memref<32x128xf32, #tpu.memory_space<vmem>>, vector<32x128xf32>
    %cst = arith.constant dense<0.000000e+00> : vector<8x128xf32>
    %2 = tpu.matmul %0, %1, %cst {dimension_numbers = #tpu.dot_dimension_numbers<[1], [0], [0], [1], [0, 0, 1, 1], [], []>} : vector<8x32xf32>, vector<32x128xf32>, vector<8x128xf32> -> vector<8x128xf32>
    %c0_3 = arith.constant 0 : index
    %c0_4 = arith.constant 0 : index
    %3 = vector.load %arg4[%c0_3, %c0_4] : memref<8x128xf32, #tpu.memory_space<vmem>>, vector<8x128xf32>
    tpu.vector_store %arg4[%c0_3, %c0_4], %2 {strides = array<i32>} : memref<8x128xf32, #tpu.memory_space<vmem>>, vector<8x128xf32>,
    return
  }
  func.func @transform_0(%arg0: i32, %arg1: i32) -> (i32, i32) {
    %c0_i32 = arith.constant 0 : i32
    %c0_i32_0 = arith.constant 0 : i32
    return %arg0, %c0_i32 : i32, i32
  }
  func.func @transform_1(%arg0: i32, %arg1: i32) -> (i32, i32) {
    %c0_i32 = arith.constant 0 : i32
    %c0_i32_0 = arith.constant 0 : i32
    return %c0_i32, %arg1 : i32, i32
  }
  func.func @transform_2(%arg0: i32, %arg1: i32) -> (i32, i32) {
    %c0_i32 = arith.constant 0 : i32
    return %arg0, %arg1 : i32, i32
  }
}

</mosaic_0001>

<bundles_post_ra>
// kernel: projection_forward.1
= control target key start
LH: loop header
LB: loop body
LE: loop exit
PB: predicated region body
PF: predicated region fallthrough
CT: control target
= control target key end

     0   :  { %7 = vsyncpa [#allocation3], 0  ;;  %s728_s0 = inlined_call_operand.hbm [shape: f32[16,32], index: 0, kind: input, shape index: {}]   ;;  %s729_s1 = inlined_call_operand.hbm [shape: f32[32,128], index: 1, kind: input, shape index: {}]   ;;  %s730_s2 = inlined_call_operand.vmem [shape: f32[16,128], index: 2, kind: output, shape index: {}]  }
   0x1   :  { %9 = vsyncpa [#allocation3 + $0x1], 0 }
   0x2   :  { %10 = vsyncpa [#allocation5], 0  ;;  %s607_s9 = smov 0   ;;  %s609_s10 = smov 0  }
   0x3   :  { %s611_s11 = smov 0   ;;  %s613_s12 = smov 0  }
   0x4   :  { %s615_s13 = smov 0   ;;  %s617_s14 = smov 0  }
   0x5 LB: > { %s376_s15 = sadd.s32 4294967295, %s584_s14   ;;  %p48_p0 = scmp.ne.s32.totalorder %s568_s10, %s564_s9  ;;  %s584_s14 = sphi %s617_s14, %s16_s14   ;;  %s580_s13 = sphi %s615_s13, %s740_s13   ;;  %s576_s12 = sphi %s613_s12, %s739_s12   ;;  %s572_s11 = sphi %s611_s11, %s738_s11   ;;  %s568_s10 = sphi %s609_s10, %s737_s10   ;;  %s564_s9 = sphi %s607_s9, %s736_s9  }
   0x6   : > { %p637_p1 = scmp.eq.s32.totalorder %s376_s15, 0  ;;  %p378_p2 = scmp.ge.s32.totalorder %s584_s14, 1 }
   0x7   : > { %p113_p3 = scmp.lt.s32.totalorder %s584_s14, 3  ;;  %s586_s19 = smov [#allocation4]  }
   0x8   : > { %p645_p4 = por %p637_p1, %p48_p0  ;;  %s127_s20 = sshll.u32 %s586_s19, 4  ;;  %s128_s20 = int_to_ptr.vmem [resolvable:$true] %s127_s20 }
   0x9   : > { %p649_p5 = pnand %p378_p2, %p113_p3  ;;  %s28_s22 = sadd.s32 1, %s580_s13 }
   0xa   : > { %s487_s23 = scalar_lea.vmem %s128_s20, 512  ;;  %p495_p12 = scmp.lt.s32.totalorder %s128_s20, %s128_s20 }
   0xb   : > { %p412_p6 = pneg %p649_p5  ;;  %p488_p9 = scmp.ne.s32.totalorder %s128_s20, %s487_s23 }
   0xc   : > { %p496_p13 = scmp.lt.s32.totalorder %s487_s23, %s487_s23 }
   0xd   : > { %p657_p7 = pnand %p412_p6, %p637_p1 }
   0xe   : > { %p497_p0 = por %p496_p13, %p495_p12 }
   0xf   : > { %p478_p8 = pneg %p657_p7 }
  0x11   : > { %p490_p10 = pnand %p488_p9, %p478_p8 }
  0x13   : > { %p491_p11 = pneg %p490_p10 }
  0x15   : > { %p498_p2 = pnand %p497_p0, %p491_p11 }
  0x17   : > { %501 = shalt.err (!%p498_p2)
}
  0x18   : > { %s587_s24 = smov 128   ;;  %s588_s25 = smov 8  }
  0x19   : > { %415 = dma.hbm_to_vmem [thread:$0]  (!%p657_p7), %s729_s1, 512, %s128_s20, [#allocation5], %s587_s24, %s587_s24, %s588_s25  }
  0x1a   : > { %p30_p3 = scmp.ge.s32.totalorder %s28_s22, 2  ;;  %s35_s28 = sadd.s32 1, %s572_s11 }
  0x1b   : > { %p42_p6 = scmp.ne.s32.totalorder %s572_s11, %s568_s10  ;;  %p43_p8 = scmp.eq.s32.totalorder %s584_s14, 0 }
  0x1c   : > { %s742_s22 = smov (%p30_p3, %s28_s22), 0  ;;  %p421_p10 = scmp.lt.s32.totalorder %s584_s14, 2 }
  0x1d   : > { %p44_p9 = por %p43_p8, %p42_p6  ;;  %s32_s29 = ssub.s32 %s580_s13, %s742_s22 }
  0x1e   : > { %s141_s30 = sand.u32 1, %s572_s11   ;;  %p33_p11 = scmp.eq.s32.totalorder %s32_s29, 0 }
  0x1f   : > { %s381_s3 = sshll.u32 %s141_s30, 3  ;;  %s382_s4 = sshll.u32 %s580_s13, 7 }
  0x20   : > { %s681_s5 = scalar_select %p33_p11, %s572_s11, %s35_s28  }
  0x21   : > { %s150_s8 = scalar_lea.hbm %s728_s0, %s382_s4  ;;  %s145_s9 = scalar_lea.vmem [#allocation2], %s381_s3 }
  0x22   : > { %s152_s15 = sshll.u32 %s145_s9, 4  ;;  %p686_p7 = pnand %p421_p10, %p44_p9  ;;  %s153_s15 = int_to_ptr.vmem [resolvable:$true] %s152_s15 }
  0x23   : > { %s142_s20 = scalar_lea.sflag [#allocation3], %s141_s30  ;;  %s515_s21 = scalar_lea.vmem %s153_s15, 128 }
  0x24   : > { %p504_p12 = pneg %p686_p7  ;;  %p516_p13 = scmp.ne.s32.totalorder %s153_s15, %s515_s21 }
  0x25   : > { %s589_s23 = smov [#allocation2]  }
  0x26   : > { %p518_p0 = pnand %p516_p13, %p504_p12  ;;  %s520_s24 = sshll.u32 %s589_s23, 4  ;;  %s521_s24 = int_to_ptr.vmem [resolvable:$false] %s520_s24 }
  0x27   : > { %s522_s25 = scalar_lea.vmem %s521_s24, 256  ;;  %p523_p3 = scmp.lt.s32.totalorder %s153_s15, %s521_s24 }
  0x28   : > { %p519_p2 = pneg %p518_p0  ;;  %p524_p6 = scmp.lt.s32.totalorder %s522_s25, %s515_s21 }
  0x2a   : > { %p525_p8 = por %p524_p6, %p523_p3 }
  0x2c   : > { %p526_p9 = pnand %p525_p8, %p519_p2 }
  0x2e   : > { %529 = shalt.err (!%p526_p9)
}
  0x2f   : > { %419 = dma.hbm_to_vmem [thread:$0]  (!%p686_p7), %s150_s8, 128, %s153_s15, %s142_s20  }
  0x30   : > { %161 = sbr.rel (%p649_p5) target bundleno = 260 (0x104), region = 28  ;;  %s163_s26 = sand.u32 (!%p649_p5), 1, %s568_s10  }
  0x31   : > { %s384_s27 = sshll.u32 (!%p649_p5), %s163_s26, 3  ;;  %s164_s28 = scalar_lea.sflag (!%p649_p5), [#allocation3], %s163_s26 }
  0x32   : > { %s167_s29 = scalar_lea.vmem (!%p649_p5), [#allocation2], %s384_s27 }
  0x35   : > { %555 = dma.done.wait (%p645_p4), %s164_s28, 128  }
  0x36   : > { %557 = vsyncadd (%p645_p4), %s164_s28, 4294967168 }
  0x37   : > { %559 = dma.done.wait (%p637_p1), [#allocation5], 512  }
  0x38   : > { %561 = vsyncadd (%p637_p1), [#allocation5], 4294966784  ;;  %v590_v0 = vmov 0.0   ;;  %vm591_vm0 = vmmov 0   ;;  %v205_v1 = vld [vmem:[#allocation4 + $0x18] sm:$0xff]  ;;  %v204_v2 = vld [vmem:[#allocation4 + $0x10] sm:$0xff] }
  0x39   : > { %395 = vmatprep.subr.mxu0 %v590_v0  ;;  %403 = vmatprep.mubr.msk.f32.mxu0 %vm591_vm0, %v590_v0  ;;  %v203_v3 = vld [vmem:[#allocation4 + $0x8] sm:$0xff]  ;;  %v202_v4 = vld [vmem:[#allocation4] sm:$0xff]  ;;  %v201_v5 = vld [vmem:[%s167_s29] sm:$0xff]  ;;  %vm206_vm1 = vcmask 261120   ;;  %p194_p1 = scmp.lt.s32.totalorder %s576_s12, 1 }
  0x3a   : > { %396 = vmatpush3.msra.mxu0 %v205_v1 }
  0x3b   : > { %397 = vmatprep.subr.mxu0 %v590_v0  ;;  %s744_s12 = smov (!%p194_p1, %s576_s12), 1 }
  0x3c   : > { %398 = vmatpush3.msra.mxu0 %v204_v2  ;;  %s386_s16 = sshll.u32 %s744_s12, 3 }
  0x3d   : > { %399 = vmatprep.subr.mxu0 %v590_v0  ;;  %s200_s30 = scalar_lea.vmem %s730_s2, %s386_s16 }
  0x3e   : > { %400 = vmatpush3.msra.mxu0 %v203_v3 }
  0x3f   : > { %401 = vmatprep.subr.mxu0 %v590_v0 }
  0x40   : > { %402 = vmatpush3.msra.mxu0 %v202_v4 }
  0x41   : > { %404 = vmatmul.mubr.msk.f32.vlgmr.msra.gmra.mxu0 %vm206_vm1, %v201_v5 }
 0x101   : > { %v276_v6 = vpop.f32.mrf.mxu0 }
 0x102   : > { %280 = vst [vmem:[%s200_s30] sm:$0xff] %v276_v6 }
 0x103   : > { %v405_v7 = vpop.f32.mrf.mxu0 }
 0x104 PF: > { %s16_s14 = sadd.s32 1, %s584_s14   ;;  %s736_s9 = smov %s568_s10 }
 0x105   : > { %p13_p4 = scmp.ge.s32.totalorder %s16_s14, 4   ;;  %s737_s10 = smov %s572_s11 }
 0x106   : > { %s738_s11 = smov %s681_s5  ;;  %s739_s12 = smov %s580_s13 }
 0x107   : > { %s740_s13 = smov %s742_s22  ;;  %15 = sbr.rel (!%p13_p4) target bundleno = 5 (0x5), region = 73 }
 0x10c   :  { %306 = vsyncpa [#allocation3], 1 }
 0x10d   :  { %308 = vsyncpa [#allocation3 + $0x1], 1 }
 0x10e   :  { %309 = vsyncpa [#allocation5], 1 }

</bundles_post_ra>
